<compile_context>
chip_gen: v6e
topology: v6e:2x2x1
jax: 0.10.0
libtpu: 0.0.40
codegen_flags: <defaults>
</compile_context>

<pallas_src>
import math

import jax
import jax.numpy as jnp
from jax import lax
from jax.experimental import pallas as pl
from jax.experimental.pallas import tpu as pltpu


# --------------------------------------------------------------------------- #
# Shared conv(3x3, zero-pad) + sigmoid helper on flat (P, H*W) planes.
# --------------------------------------------------------------------------- #
def _spatial_gate(avg, mx, w_ref, masks, W, HW):
    """avg, mx: (P, HW) f32 planes.  masks: (4, HW) f32 border masks
    [row-1 ok, row+1 ok, col-1 ok, col+1 ok].  w_ref: SMEM (19,) f32 =
    conv weight (1,2,3,3) row-major + bias.  Returns sigmoid(conv): (P, HW) f32."""
    row_m = {-1: masks[0:1], 1: masks[1:2]}
    col_m = {-1: masks[2:3], 1: masks[3:4]}

    def shift(q, d, m):
        # q[f] -> q[f + d], zero-filled outside the valid region (XLU roll + mul).
        return pltpu.roll(q, shift=(-d) % HW, axis=1) * m

    rs_a = {0: avg, -1: shift(avg, -W, row_m[-1]), 1: shift(avg, W, row_m[1])}
    rs_m = {0: mx, -1: shift(mx, -W, row_m[-1]), 1: shift(mx, W, row_m[1])}

    def w_at(ic, si, sj):   # conv weight[0, ic, si+1, sj+1]
        return w_ref[ic * 9 + (si + 1) * 3 + (sj + 1)]

    # conv[f] = bias + sum_sj colshift_sj( sum_si sum_ic w[ic,si,sj] *
    #                                      rowshift_si(plane_ic) )[f]
    terms = []
    for sj in (-1, 0, 1):
        inner = ((w_at(0, -1, sj) * rs_a[-1] + w_at(1, -1, sj) * rs_m[-1])
                 + (w_at(0, 0, sj) * rs_a[0] + w_at(1, 0, sj) * rs_m[0])
                 + (w_at(0, 1, sj) * rs_a[1] + w_at(1, 1, sj) * rs_m[1]))
        terms.append(inner if sj == 0 else shift(inner, sj, col_m[sj]))
    conv = (terms[0] + terms[1]) + (terms[2] + w_ref[18])
    return jax.nn.sigmoid(conv)


# --------------------------------------------------------------------------- #
# Kernels.
# --------------------------------------------------------------------------- #
def _make_fused_kernel(inv_c, W, HW):
    """Single-pass kernel: block = (Bt, C, HW); whole reduction + conv + gate."""
    def kernel(w_ref, mask_ref, x_ref, o_ref):
        x = x_ref[...]                                              # (Bt, C, HW)
        masks = mask_ref[...]                                       # (4, HW) f32
        avg = jnp.sum(x, axis=1, dtype=jnp.float32) * inv_c         # (Bt, HW) f32
        mx = jnp.max(x, axis=1).astype(jnp.float32)                 # (Bt, HW) f32
        gate = _spatial_gate(avg, mx, w_ref, masks, W, HW).astype(x.dtype)
        o_ref[...] = (x * gate[:, None, :]).astype(o_ref.dtype)
    return kernel


def _make_reduce_gate_kernel(inv_c, W, HW):
    """Pass 1 of the channel-tiled fallback: grid=(B, Cc), C axis 'arbitrary'.
    Accumulates channel sum/max into f32 scratch; writes the gate on last step."""
    def kernel(w_ref, mask_ref, x_ref, g_ref, sum_sc, max_sc):
        c = pl.program_id(1)

        @pl.when(c == 0)
        def _():
            sum_sc[...] = jnp.zeros_like(sum_sc)
            max_sc[...] = jnp.full_like(max_sc, -jnp.inf)

        x = x_ref[0]                                                # (Ct, HW)
        sum_sc[...] += jnp.sum(x, axis=0, keepdims=True, dtype=jnp.float32)
        max_sc[...] = jnp.maximum(
            max_sc[...], jnp.max(x, axis=0, keepdims=True).astype(jnp.float32))

        @pl.when(c == pl.num_programs(1) - 1)
        def _():
            gate = _spatial_gate(sum_sc[...] * inv_c, max_sc[...],
                                 w_ref, mask_ref[...], W, HW)
            g_ref[0] = gate.astype(g_ref.dtype)
    return kernel


def _gating_kernel(g_ref, x_ref, o_ref):
    """Pass 2 of the channel-tiled fallback: out = x * gate (broadcast)."""
    o_ref[...] = (x_ref[...] * g_ref[...]).astype(o_ref.dtype)


# --------------------------------------------------------------------------- #
# Host-side helpers.
# --------------------------------------------------------------------------- #
def _vmem_budget_bytes():
    """Per-generation scoped-VMEM budget with headroom for compiler scratch."""
    cap = 128 << 20
    try:
        cap = int(getattr(pltpu.get_tpu_info(), "vmem_capacity_bytes", cap))
    except Exception:
        pass
    # ~25% headroom: 64 MiB (v7x) -> 48 MiB budget, 128 MiB (v5e/v6e) -> 96 MiB.
    return int(max(16 << 20, min((cap * 3) // 4, 100 << 20)))


def _largest_divisor_leq(n, cap):
    cap = max(1, min(int(n), int(cap)))
    for d in range(cap, 0, -1):
        if n % d == 0:
            return d
    return 1


def _border_masks(H, W):
    """Grid-invariant border masks for the roll-based 3x3 conv, (4, H*W) f32."""
    HW = H * W
    f = jnp.arange(HW, dtype=jnp.int32)
    j = f % W
    return jnp.stack([f >= W, f < (H - 1) * W, j >= 1, j < (W - 1)],
                     axis=0).astype(jnp.float32)


def _pick_channel_tile(C, HW, itemsize, budget):
    """Largest divisor of C (full C or multiple of 8) whose block double-buffers."""
    slack = 8 << 20

    def fits(ct):
        return 4 * ct * HW * itemsize + slack <= budget

    divisors = [d for d in range(C, 0, -1) if C % d == 0]
    for d in divisors:
        if (d == C or d % 8 == 0) and fits(d):
            return d
    for d in divisors:
        if fits(d):
            return d
    return 1


def _sam_forward_channel_tiled(x_flat, w_flat, masks, H, W, Ct, budget):
    """Two-pass path for blocks too large to double-buffer whole-image."""
    B, C, HW = x_flat.shape
    itemsize = jnp.dtype(x_flat.dtype).itemsize
    Cc = C // Ct
    inv_c = 1.0 / C

    # ---- pass 1: channel reduction -> conv -> sigmoid gate ------------------ #
    vmem_a = int(min(budget, max(
        16 << 20,
        2 * Ct * HW * itemsize + 2 * HW * itemsize + 48 * HW * 4 + (2 << 20))))
    gate = pl.pallas_call(
        _make_reduce_gate_kernel(inv_c, W, HW),
        out_shape=jax.ShapeDtypeStruct((B, 1, HW), x_flat.dtype),
        grid_spec=pltpu.PrefetchScalarGridSpec(
            num_scalar_prefetch=0,
            grid=(B, Cc),
            in_specs=[
                pl.BlockSpec(memory_space=pltpu.MemorySpace.SMEM),     # weights
                pl.BlockSpec((4, HW), lambda b, c: (0, 0)),            # masks
                pl.BlockSpec((1, Ct, HW), lambda b, c: (b, c, 0)),     # x
            ],
            out_specs=pl.BlockSpec((1, 1, HW), lambda b, c: (b, 0, 0)),
            scratch_shapes=[pltpu.VMEM((1, HW), jnp.float32),          # sum
                            pltpu.VMEM((1, HW), jnp.float32)],         # max
        ),
        compiler_params=pltpu.CompilerParams(
            dimension_semantics=("parallel", "arbitrary"),
            vmem_limit_bytes=vmem_a),
        cost_estimate=pl.CostEstimate(
            flops=int(2 * B * C * HW + 40 * B * HW),
            transcendentals=int(B * HW),
            bytes_accessed=int(B * C * HW * itemsize + B * HW * itemsize)),
    )(w_flat, masks, x_flat)

    # ---- pass 2: gating multiply -------------------------------------------- #
    vmem_b = int(min(budget, max(
        16 << 20, 4 * Ct * HW * itemsize + 2 * HW * itemsize + (2 << 20))))
    out_flat = pl.pallas_call(
        _gating_kernel,
        out_shape=jax.ShapeDtypeStruct((B, C, HW), x_flat.dtype),
        grid_spec=pltpu.PrefetchScalarGridSpec(
            num_scalar_prefetch=0,
            grid=(B, Cc),
            in_specs=[
                pl.BlockSpec((1, 1, HW), lambda b, c: (b, 0, 0)),      # gate
                pl.BlockSpec((1, Ct, HW), lambda b, c: (b, c, 0)),     # x
            ],
            out_specs=pl.BlockSpec((1, Ct, HW), lambda b, c: (b, c, 0)),
        ),
        compiler_params=pltpu.CompilerParams(
            dimension_semantics=("parallel", "parallel"),
            vmem_limit_bytes=vmem_b),
        cost_estimate=pl.CostEstimate(
            flops=int(B * C * HW),
            transcendentals=0,
            bytes_accessed=int((2 * B * C * HW + B * HW) * itemsize)),
    )(gate, x_flat)
    return out_flat


# --------------------------------------------------------------------------- #
# Public forward.
# --------------------------------------------------------------------------- #
def sam_forward(x, conv_w, conv_b, *, _force_channel_tile=None):
    """x: (B, C, H, W); conv_w: (1, 2, 3, 3); conv_b: (1,)."""
    B, C, H, W = x.shape
    HW = H * W
    itemsize = jnp.dtype(x.dtype).itemsize

    x_flat = x.reshape(B, C, HW)                      # free contiguous merge
    w_flat = jnp.concatenate(
        [conv_w.reshape(-1), conv_b.reshape(-1)]).astype(jnp.float32)   # (19,)
    masks = _border_masks(H, W)                       # hoisted, (4, HW) f32

    budget = _vmem_budget_bytes()
    block1 = C * HW * itemsize                        # one batch element

    def fused_step_bytes(bt):
        # in + out blocks double-buffered + f32 plane temporaries + masks + slack
        return 4 * bt * block1 + 32 * bt * HW * 4 + 4 * HW * 4 + (2 << 20)

    if _force_channel_tile is None and fused_step_bytes(1) <= budget:
        # ---- fused single-pass path ----------------------------------------- #
        # Fold Bt batch elements per block so each step moves ~2-8 MiB, but keep
        # enough parallel grid steps for v7x's 2 TCs + pipelining, and stay
        # inside the per-generation VMEM budget.
        target_step = 8 << 20
        by_bytes = max(1, target_step // max(block1, 1))
        by_steps = max(1, B // 4)
        by_budget = max(1, (budget - (4 << 20)) // max(1, 4 * block1 + 32 * HW * 4))
        Bt = _largest_divisor_leq(B, min(by_bytes, by_steps, by_budget))
        nb = B // Bt
        # TODO(synk): for B == 1 on v7x, add a halo-tiled spatial grid axis so
        # both TensorCores get work; a single-step grid leaves one TC idle.

        vmem_limit = int(min(budget, max(16 << 20, fused_step_bytes(Bt))))
        cost = pl.CostEstimate(
            flops=int(3 * B * C * HW + 40 * B * HW),   # sum + max + gate + conv
            transcendentals=int(B * HW),               # sigmoid
            bytes_accessed=int(2 * B * C * HW * itemsize))

        out_flat = pl.pallas_call(
            _make_fused_kernel(1.0 / C, W, HW),
            out_shape=jax.ShapeDtypeStruct((B, C, HW), x.dtype),
            grid_spec=pltpu.PrefetchScalarGridSpec(
                num_scalar_prefetch=0,
                grid=(nb,),
                in_specs=[
                    pl.BlockSpec(memory_space=pltpu.MemorySpace.SMEM),  # weights
                    pl.BlockSpec((4, HW), lambda b: (0, 0)),            # masks
                    pl.BlockSpec((Bt, C, HW), lambda b: (b, 0, 0)),     # x
                ],
                out_specs=pl.BlockSpec((Bt, C, HW), lambda b: (b, 0, 0)),
            ),
            compiler_params=pltpu.CompilerParams(
                dimension_semantics=("parallel",),
                vmem_limit_bytes=vmem_limit),
            cost_estimate=cost,
        )(w_flat, masks, x_flat)
    else:
        # ---- channel-tiled two-pass fallback --------------------------------- #
        if _force_channel_tile is not None:
            Ct = int(_force_channel_tile)
            assert C % Ct == 0, "forced channel tile must divide C"
        else:
            Ct = _pick_channel_tile(C, HW, itemsize, budget)
        out_flat = _sam_forward_channel_tiled(x_flat, w_flat, masks, H, W, Ct, budget)

    return out_flat.reshape(B, C, H, W)


def sam_reference(x, conv_w, conv_b):
    """Pure-JAX reference mirroring the PyTorch forward exactly."""
    avg = jnp.mean(x, axis=1, keepdims=True)
    mx = jnp.max(x, axis=1, keepdims=True)
    cat = jnp.concatenate([avg, mx], axis=1)
    y = lax.conv_general_dilated(
        cat, conv_w, window_strides=(1, 1), padding=((1, 1), (1, 1)),
        dimension_numbers=("NCHW", "OIHW", "NCHW"))
    y = y + conv_b.reshape(1, 1, 1, 1)
    return x * jax.nn.sigmoid(y)


if __name__ == "__main__":
    key = jax.random.PRNGKey(0)
    kx, kw, kb, kx2 = jax.random.split(key, 4)

    # Deterministic init for conv_after_concat (Conv2d(2, 1, 3, padding=1)),
    # kaiming-uniform-style bound like PyTorch's default.
    fan_in = 2 * 3 * 3
    bound = 1.0 / math.sqrt(fan_in)
    conv_w = jax.random.uniform(kw, (1, 2, 3, 3), jnp.float32, -bound, bound)
    conv_b = jax.random.uniform(kb, (1,), jnp.float32, -bound, bound)

    # Path 1: fused single-pass kernel.
    B, C, H, W = 2, 4, 16, 16
    x = jax.random.normal(kx, (B, C, H, W), dtype=jnp.float32)
    out = jax.block_until_ready(sam_forward(x, conv_w, conv_b))
    ref = sam_reference(x, conv_w, conv_b)
    assert out.shape == (B, C, H, W)
    assert jnp.allclose(out, ref, atol=1e-5, rtol=1e-5), (
        "fused Pallas kernel output does not match JAX reference")

    # Path 2: channel-tiled two-pass fallback (forced here to exercise it; it is
    # auto-selected when a whole-image block exceeds the per-gen VMEM budget).
    B2, C2 = 2, 16
    x2 = jax.random.normal(kx2, (B2, C2, H, W), dtype=jnp.float32)
    out2 = jax.block_until_ready(
        sam_forward(x2, conv_w, conv_b, _force_channel_tile=8))
    ref2 = sam_reference(x2, conv_w, conv_b)
    assert jnp.allclose(out2, ref2, atol=1e-5, rtol=1e-5), (
        "channel-tiled Pallas kernels output does not match JAX reference")

    print("KERNEL_OK")
</pallas_src>

<mosaic_0001>
module attributes {stable_mosaic.version = 11 : i64} {
  func.func @kernel(%arg0: i32, %arg1: memref<19xf32, #tpu.memory_space<smem>>, %arg2: memref<4x256xf32, #tpu.memory_space<vmem>>, %arg3: memref<1x4x256xf32, #tpu.memory_space<vmem>>, %arg4: memref<1x4x256xf32, #tpu.memory_space<vmem>>) attributes {dimension_semantics = [#tpu.dimension_semantics<parallel>], iteration_bounds = array<i64: 2>, scalar_prefetch = 0 : i64, scratch_operands = 0 : i64, tpu.core_type = #tpu.core_type<tc>, window_params = [{transform_indices = @transform_0, window_bounds = array<i64: 19>}, {pipeline_mode = #tpu.pipeline_mode<synchronous>, transform_indices = @transform_1, window_bounds = array<i64: 4, 256>}, {transform_indices = @transform_2, window_bounds = array<i64: 1, 4, 256>}, {transform_indices = @transform_3, window_bounds = array<i64: 1, 4, 256>}]} {
    %c0 = arith.constant 0 : index
    %c0_0 = arith.constant 0 : index
    %c0_1 = arith.constant 0 : index
    %0 = vector.load %arg3[%c0, %c0_0, %c0_1] : memref<1x4x256xf32, #tpu.memory_space<vmem>>, vector<1x4x256xf32>
    %c0_2 = arith.constant 0 : index
    %c0_3 = arith.constant 0 : index
    %1 = vector.load %arg2[%c0_2, %c0_3] : memref<4x256xf32, #tpu.memory_space<vmem>>, vector<4x256xf32>
    %cst = arith.constant dense<0.000000e+00> : vector<1x256xf32>
    %2 = vector.multi_reduction <add>, %0, %cst [1] : vector<1x4x256xf32> to vector<1x256xf32>
    %cst_4 = arith.constant 2.500000e-01 : f32
    %3 = vector.broadcast %cst_4 : f32 to vector<1x256xf32>
    %4 = arith.mulf %2, %3 : vector<1x256xf32>
    %cst_5 = arith.constant dense<0xFF800000> : vector<1x256xf32>
    %5 = vector.multi_reduction <maximumf>, %0, %cst_5 [1] : vector<1x4x256xf32> to vector<1x256xf32>
    %6 = vector.extract_strided_slice %1 {offsets = [0, 0], sizes = [1, 256], strides = [1, 1]} : vector<4x256xf32> to vector<1x256xf32>
    %7 = vector.extract_strided_slice %1 {offsets = [1, 0], sizes = [1, 256], strides = [1, 1]} : vector<4x256xf32> to vector<1x256xf32>
    %8 = vector.extract_strided_slice %1 {offsets = [2, 0], sizes = [1, 256], strides = [1, 1]} : vector<4x256xf32> to vector<1x256xf32>
    %9 = vector.extract_strided_slice %1 {offsets = [3, 0], sizes = [1, 256], strides = [1, 1]} : vector<4x256xf32> to vector<1x256xf32>
    %c16_i32 = arith.constant 16 : i32
    %10 = tpu.dynamic_rotate %4 by %c16_i32 dim 1 : vector<1x256xf32>, i32 -> vector<1x256xf32>
    %11 = arith.mulf %10, %6 : vector<1x256xf32>
    %c240_i32 = arith.constant 240 : i32
    %12 = tpu.dynamic_rotate %4 by %c240_i32 dim 1 : vector<1x256xf32>, i32 -> vector<1x256xf32>
    %13 = arith.mulf %12, %7 : vector<1x256xf32>
    %c16_i32_6 = arith.constant 16 : i32
    %14 = tpu.dynamic_rotate %5 by %c16_i32_6 dim 1 : vector<1x256xf32>, i32 -> vector<1x256xf32>
    %15 = arith.mulf %14, %6 : vector<1x256xf32>
    %c240_i32_7 = arith.constant 240 : i32
    %16 = tpu.dynamic_rotate %5 by %c240_i32_7 dim 1 : vector<1x256xf32>, i32 -> vector<1x256xf32>
    %17 = arith.mulf %16, %7 : vector<1x256xf32>
    %c0_8 = arith.constant 0 : index
    %18 = memref.load %arg1[%c0_8] : memref<19xf32, #tpu.memory_space<smem>>
    %19 = vector.broadcast %18 : f32 to vector<1x256xf32>
    %20 = arith.mulf %19, %11 : vector<1x256xf32>
    %c9 = arith.constant 9 : index
    %21 = memref.load %arg1[%c9] : memref<19xf32, #tpu.memory_space<smem>>
    %22 = vector.broadcast %21 : f32 to vector<1x256xf32>
    %23 = arith.mulf %22, %15 : vector<1x256xf32>
    %24 = arith.addf %20, %23 : vector<1x256xf32>
    %c3 = arith.constant 3 : index
    %25 = memref.load %arg1[%c3] : memref<19xf32, #tpu.memory_space<smem>>
    %26 = vector.broadcast %25 : f32 to vector<1x256xf32>
    %27 = arith.mulf %26, %4 : vector<1x256xf32>
    %c12 = arith.constant 12 : index
    %28 = memref.load %arg1[%c12] : memref<19xf32, #tpu.memory_space<smem>>
    %29 = vector.broadcast %28 : f32 to vector<1x256xf32>
    %30 = arith.mulf %29, %5 : vector<1x256xf32>
    %31 = arith.addf %27, %30 : vector<1x256xf32>
    %32 = arith.addf %24, %31 : vector<1x256xf32>
    %c6 = arith.constant 6 : index
    %33 = memref.load %arg1[%c6] : memref<19xf32, #tpu.memory_space<smem>>
    %34 = vector.broadcast %33 : f32 to vector<1x256xf32>
    %35 = arith.mulf %34, %13 : vector<1x256xf32>
    %c15 = arith.constant 15 : index
    %36 = memref.load %arg1[%c15] : memref<19xf32, #tpu.memory_space<smem>>
    %37 = vector.broadcast %36 : f32 to vector<1x256xf32>
    %38 = arith.mulf %37, %17 : vector<1x256xf32>
    %39 = arith.addf %35, %38 : vector<1x256xf32>
    %40 = arith.addf %32, %39 : vector<1x256xf32>
    %c1_i32 = arith.constant 1 : i32
    %41 = tpu.dynamic_rotate %40 by %c1_i32 dim 1 : vector<1x256xf32>, i32 -> vector<1x256xf32>
    %42 = arith.mulf %41, %8 : vector<1x256xf32>
    %c1 = arith.constant 1 : index
    %43 = memref.load %arg1[%c1] : memref<19xf32, #tpu.memory_space<smem>>
    %44 = vector.broadcast %43 : f32 to vector<1x256xf32>
    %45 = arith.mulf %44, %11 : vector<1x256xf32>
    %c10 = arith.constant 10 : index
    %46 = memref.load %arg1[%c10] : memref<19xf32, #tpu.memory_space<smem>>
    %47 = vector.broadcast %46 : f32 to vector<1x256xf32>
    %48 = arith.mulf %47, %15 : vector<1x256xf32>
    %49 = arith.addf %45, %48 : vector<1x256xf32>
    %c4 = arith.constant 4 : index
    %50 = memref.load %arg1[%c4] : memref<19xf32, #tpu.memory_space<smem>>
    %51 = vector.broadcast %50 : f32 to vector<1x256xf32>
    %52 = arith.mulf %51, %4 : vector<1x256xf32>
    %c13 = arith.constant 13 : index
    %53 = memref.load %arg1[%c13] : memref<19xf32, #tpu.memory_space<smem>>
    %54 = vector.broadcast %53 : f32 to vector<1x256xf32>
    %55 = arith.mulf %54, %5 : vector<1x256xf32>
    %56 = arith.addf %52, %55 : vector<1x256xf32>
    %57 = arith.addf %49, %56 : vector<1x256xf32>
    %c7 = arith.constant 7 : index
    %58 = memref.load %arg1[%c7] : memref<19xf32, #tpu.memory_space<smem>>
    %59 = vector.broadcast %58 : f32 to vector<1x256xf32>
    %60 = arith.mulf %59, %13 : vector<1x256xf32>
    %c16 = arith.constant 16 : index
    %61 = memref.load %arg1[%c16] : memref<19xf32, #tpu.memory_space<smem>>
    %62 = vector.broadcast %61 : f32 to vector<1x256xf32>
    %63 = arith.mulf %62, %17 : vector<1x256xf32>
    %64 = arith.addf %60, %63 : vector<1x256xf32>
    %65 = arith.addf %57, %64 : vector<1x256xf32>
    %c2 = arith.constant 2 : index
    %66 = memref.load %arg1[%c2] : memref<19xf32, #tpu.memory_space<smem>>
    %67 = vector.broadcast %66 : f32 to vector<1x256xf32>
    %68 = arith.mulf %67, %11 : vector<1x256xf32>
    %c11 = arith.constant 11 : index
    %69 = memref.load %arg1[%c11] : memref<19xf32, #tpu.memory_space<smem>>
    %70 = vector.broadcast %69 : f32 to vector<1x256xf32>
    %71 = arith.mulf %70, %15 : vector<1x256xf32>
    %72 = arith.addf %68, %71 : vector<1x256xf32>
    %c5 = arith.constant 5 : index
    %73 = memref.load %arg1[%c5] : memref<19xf32, #tpu.memory_space<smem>>
    %74 = vector.broadcast %73 : f32 to vector<1x256xf32>
    %75 = arith.mulf %74, %4 : vector<1x256xf32>
    %c14 = arith.constant 14 : index
    %76 = memref.load %arg1[%c14] : memref<19xf32, #tpu.memory_space<smem>>
    %77 = vector.broadcast %76 : f32 to vector<1x256xf32>
    %78 = arith.mulf %77, %5 : vector<1x256xf32>
    %79 = arith.addf %75, %78 : vector<1x256xf32>
    %80 = arith.addf %72, %79 : vector<1x256xf32>
    %c8 = arith.constant 8 : index
    %81 = memref.load %arg1[%c8] : memref<19xf32, #tpu.memory_space<smem>>
    %82 = vector.broadcast %81 : f32 to vector<1x256xf32>
    %83 = arith.mulf %82, %13 : vector<1x256xf32>
    %c17 = arith.constant 17 : index
    %84 = memref.load %arg1[%c17] : memref<19xf32, #tpu.memory_space<smem>>
    %85 = vector.broadcast %84 : f32 to vector<1x256xf32>
    %86 = arith.mulf %85, %17 : vector<1x256xf32>
    %87 = arith.addf %83, %86 : vector<1x256xf32>
    %88 = arith.addf %80, %87 : vector<1x256xf32>
    %c255_i32 = arith.constant 255 : i32
    %89 = tpu.dynamic_rotate %88 by %c255_i32 dim 1 : vector<1x256xf32>, i32 -> vector<1x256xf32>
    %90 = arith.mulf %89, %9 : vector<1x256xf32>
    %91 = arith.addf %42, %65 : vector<1x256xf32>
    %c18 = arith.constant 18 : index
    %92 = memref.load %arg1[%c18] : memref<19xf32, #tpu.memory_space<smem>>
    %93 = vector.broadcast %92 : f32 to vector<1x256xf32>
    %94 = arith.addf %90, %93 : vector<1x256xf32>
    %95 = arith.addf %91, %94 : vector<1x256xf32>
    %96 = arith.negf %95 : vector<1x256xf32>
    %97 = math.exp %96 : vector<1x256xf32>
    %cst_9 = arith.constant 1.000000e+00 : f32
    %98 = vector.broadcast %cst_9 : f32 to vector<1x256xf32>
    %99 = arith.addf %98, %97 : vector<1x256xf32>
    %100 = arith.divf %98, %99 : vector<1x256xf32>
    %101 = vector.shape_cast %100 : vector<1x256xf32> to vector<1x1x256xf32>
    %102 = vector.broadcast %101 : vector<1x1x256xf32> to vector<1x4x256xf32>
    %103 = arith.mulf %0, %102 : vector<1x4x256xf32>
    %c0_10 = arith.constant 0 : index
    %c0_11 = arith.constant 0 : index
    %c0_12 = arith.constant 0 : index
    %104 = vector.load %arg4[%c0_10, %c0_11, %c0_12] : memref<1x4x256xf32, #tpu.memory_space<vmem>>, vector<1x4x256xf32>
    tpu.vector_store %arg4[%c0_10, %c0_11, %c0_12], %103 {strides = array<i32>} : memref<1x4x256xf32, #tpu.memory_space<vmem>>, vector<1x4x256xf32>,
    return
  }
  func.func @transform_0(%arg0: i32) -> i32 {
    %c0_i32 = arith.constant 0 : i32
    %c0_i32_0 = arith.constant 0 : i32
    return %c0_i32 : i32
  }
  func.func @transform_1(%arg0: i32) -> (i32, i32) {
    %c0_i32 = arith.constant 0 : i32
    %c0_i32_0 = arith.constant 0 : i32
    %c0_i32_1 = arith.constant 0 : i32
    return %c0_i32, %c0_i32_0 : i32, i32
  }
  func.func @transform_2(%arg0: i32) -> (i32, i32, i32) {
    %c0_i32 = arith.constant 0 : i32
    %c0_i32_0 = arith.constant 0 : i32
    %c0_i32_1 = arith.constant 0 : i32
    return %arg0, %c0_i32, %c0_i32_0 : i32, i32, i32
  }
  func.func @transform_3(%arg0: i32) -> (i32, i32, i32) {
    %c0_i32 = arith.constant 0 : i32
    %c0_i32_0 = arith.constant 0 : i32
    %c0_i32_1 = arith.constant 0 : i32
    return %arg0, %c0_i32, %c0_i32_0 : i32, i32, i32
  }
}

</mosaic_0001>

<bundles_post_ra>
// kernel: tpu_custom_call.1
= control target key start
LH: loop header
LB: loop body
LE: loop exit
PB: predicated region body
PF: predicated region fallthrough
CT: control target
= control target key end

     0   :  { %8 = vsyncpa [#allocation5], 0  ;;  %s1156_s0 = inlined_call_operand.hbm [shape: f32[19], index: 0, kind: input, shape index: {}]   ;;  %s1157_s1 = inlined_call_operand.hbm [shape: f32[4,256], index: 1, kind: input, shape index: {}]   ;;  %s1158_s2 = inlined_call_operand.hbm [shape: f32[2,4,256], index: 2, kind: input, shape index: {}]   ;;  %s1159_s3 = inlined_call_operand.hbm [shape: f32[2,4,256], index: 3, kind: output, shape index: {}]  }
   0x1   :  { %9 = vsyncpa [#allocation3], 0 }
   0x2   :  { %10 = vsyncpa [#allocation8], 0 }
   0x3   :  { %12 = vsyncpa [#allocation8 + $0x1], 0 }
   0x4   :  { %13 = vsyncpa [#allocation4], 0 }
   0x5   :  { %15 = vsyncpa [#allocation4 + $0x1], 0  ;;  %s875_s12 = smov 0   ;;  %s877_s13 = smov 0  }
   0x6   :  { %s879_s14 = smov 0   ;;  %s881_s15 = smov 0  }
   0x7 LB: > { %s896_s16 = sadd.s32 4294967295, %s845_s15   ;;  %s588_s17 = sadd.s32 4294967294, %s845_s15   ;;  %s845_s15 = sphi %s881_s15, %s1183_s15   ;;  %s841_s14 = sphi %s879_s14, %s1182_s14   ;;  %s837_s13 = sphi %s877_s13, %s1181_s13   ;;  %s833_s12 = sphi %s875_s12, %s1180_s12  }
   0x8   : > { %p83_p0 = scmp.ne.s32.totalorder %s837_s13, %s833_s12  ;;  %p1160_p1 = scmp.eq.s32.totalorder %s896_s16, 0 }
   0x9   : > { %p107_p2 = scmp.eq.s32.totalorder %s896_s16, 1  ;;  %p113_p3 = scmp.eq.s32.totalorder %s588_s17, 1 }
   0xa   : > { %p905_p4 = por %p1160_p1, %p83_p0  ;;  %p589_p5 = scmp.ge.s32.totalorder %s845_s15, 1 }
   0xb   : > { %p910_p6 = por %p113_p3, %p83_p0  ;;  %p120_p7 = scmp.lt.s32.totalorder %s845_s15, 3 }
   0xc   : > { %s1164_s18 = scalar_select %p905_p4, 1, 0 }
   0xd   : > { %s1165_s19 = scalar_select %p910_p6, 1, 0 }
   0xe   : > { %p915_p8 = pnand %p589_p5, %p120_p7  ;;  %s847_s21 = smov [#allocation6]  }
   0xf   : > { %s142_s22 = sshll.u32 %s847_s21, 4  ;;  %s929_s24 = sadd.s32 1, %s845_s15   ;;  %s143_s22 = int_to_ptr.vmem [resolvable:$true] %s142_s22 }
  0x10   : > { %s1166_s20 = scalar_select %p915_p8, 1, 0 }
  0x11   : > { %p640_p10 = pneg %p915_p8  ;;  %s67_s25 = ssub.s32 %s845_s15, %s929_s24 }
  0x12   : > { %s70_s26 = sadd.s32 1, %s841_s14  ;;  %p934_p12 = scmp.eq.s32.totalorder %s67_s25, 0 }
  0x13   : > { %p924_p11 = pnand %p640_p10, %p1160_p1  ;;  %s848_s28 = smov [#allocation2]  }
  0x14   : > { %s730_s4 = scalar_lea.vmem %s143_s22, 128  ;;  %p738_p7 = scmp.lt.s32.totalorder %s143_s22, %s143_s22 }
  0x15   : > { %643 = dma.hbm_to_smem (!%p924_p11), %s1156_s0, 16, %s848_s28, [#allocation5]  }
  0x16   : > { %p721_p13 = pneg %p924_p11  ;;  %p731_p0 = scmp.ne.s32.totalorder %s143_s22, %s730_s4 }
  0x17   : > { %p739_p10 = scmp.lt.s32.totalorder %s730_s4, %s730_s4 }
  0x18   : > { %p733_p3 = pnand %p731_p0, %p721_p13 }
  0x19   : > { %p740_p9 = por %p739_p10, %p738_p7 }
  0x1a   : > { %p734_p5 = pneg %p733_p3 }
  0x1c   : > { %p741_p1 = pnand %p740_p9, %p734_p5 }
  0x1e   : > { %744 = shalt.err (!%p741_p1)
}
  0x1f   : > { %646 = dma.hbm_to_vmem [thread:$0]  (!%p924_p11), %s1157_s1, 128, %s143_s22, [#allocation3]  }
  0x20   : > { %s953_s7 = scalar_select %p934_p12, %s841_s14, %s70_s26  }
  0x21   : > { %p77_p9 = scmp.ne.s32.totalorder %s841_s14, %s837_s13  ;;  %p78_p1 = scmp.eq.s32.totalorder %s845_s15, 0 }
  0x22   : > { %p657_p13 = scmp.lt.s32.totalorder %s845_s15, 2  ;;  %s153_s8 = sand.u32 1, %s841_s14  }
  0x23   : > { %p79_p0 = por %p78_p1, %p77_p9  ;;  %p962_p3 = por %p107_p2, %p77_p9 }
  0x24   : > { %s593_s10 = sshll.u32 %s153_s8, 3  ;;  %s626_s11 = sshll.u32 %s845_s15, 7 }
  0x25   : > { %s1169_s9 = scalar_select %p962_p3, 1, 0 }
  0x26   : > { %s970_s23 = scalar_lea.hbm %s1158_s2, %s626_s11  ;;  %s157_s22 = scalar_lea.vmem [#allocation7], %s593_s10 }
  0x27   : > { %s165_s25 = sshll.u32 %s157_s22, 4  ;;  %p972_p11 = pnand %p657_p13, %p79_p0  ;;  %s166_s25 = int_to_ptr.vmem [resolvable:$true] %s165_s25 }
  0x28   : > { %s154_s27 = scalar_lea.sflag [#allocation8], %s153_s8  ;;  %s745_s28 = scalar_lea.hbm %s970_s23, 128 }
  0x29   : > { %p746_p2 = scmp.ne.s32.totalorder %s970_s23, %s745_s28  ;;  %p747_p12 = pneg %p972_p11 }
  0x2a   : > { %s750_s4 = scalar_lea.hbm %s1158_s2, 256  ;;  %p751_p10 = scmp.lt.s32.totalorder %s970_s23, %s1158_s2 }
  0x2b   : > { %p748_p5 = pnand %p747_p12, %p746_p2  ;;  %p752_p9 = scmp.lt.s32.totalorder %s750_s4, %s745_s28 }
  0x2d   : > { %p749_p7 = pneg %p748_p5  ;;  %p753_p1 = por %p752_p9, %p751_p10 }
  0x2f   : > { %p754_p13 = pnand %p753_p1, %p749_p7 }
  0x31   : > { %757 = shalt.err (!%p754_p13)
}
  0x32   : > { %s758_s10 = scalar_lea.vmem %s166_s25, 128  ;;  %s849_s8 = smov [#allocation7]  }
  0x33   : > { %p759_p0 = scmp.ne.s32.totalorder %s166_s25, %s758_s10  ;;  %s763_s11 = sshll.u32 %s849_s8, 4  ;;  %s764_s11 = int_to_ptr.vmem [resolvable:$false] %s763_s11 }
  0x34   : > { %s765_s17 = scalar_lea.vmem %s764_s11, 256  ;;  %p766_p2 = scmp.lt.s32.totalorder %s166_s25, %s764_s11 }
  0x35   : > { %p761_p6 = pnand %p759_p0, %p747_p12  ;;  %p767_p5 = scmp.lt.s32.totalorder %s765_s17, %s758_s10 }
  0x37   : > { %p762_p3 = pneg %p761_p6  ;;  %p768_p4 = por %p767_p5, %p766_p2 }
  0x39   : > { %p769_p8 = pnand %p768_p4, %p762_p3 }
  0x3b   : > { %772 = shalt.err (!%p769_p8)
}
  0x3c   : > { %650 = dma.hbm_to_vmem [thread:$0]  (!%p972_p11), %s970_s23, 128, %s166_s25, %s154_s27  }
  0x3d   : > { %p1171_p7 = scmp.ne.s32.totalorder %s1166_s20, 0 }
  0x3e   : > { %p1172_p10 = scmp.eq.s32.totalorder (!%p1171_p7), %s896_s16, 0 }
  0x3f   : > { %174 = sbr.rel (%p1171_p7) target bundleno = 409 (0x199), region = 32 }
  0x44   : > { %816 = dma.done.wait (%p1172_p10), [#allocation5], 16   ;;  %p1173_p6 = pmov %p1172_p10 }
  0x46   : > { %818 = vsyncadd (%p1173_p6), [#allocation5], 4294967280  ;;  %p1174_p12 = pmov %p1173_p6 }
  0x47   : > { %p1175_p9 = pmov %p1173_p6 }
  0x48   : > { %820 = dma.done.wait (%p1174_p12), [#allocation3], 128  }
  0x49   : > { %822 = vsyncadd (%p1175_p9), [#allocation3], 4294967168  ;;  %s1001_s21 = sand.u32 1, %s837_s13   ;;  %p1176_p4 = scmp.ne.s32.totalorder %s1164_s18, 0 }
  0x4a   : > { %s599_s20 = sshll.u32 %s1001_s21, 3  ;;  %s185_s23 = scalar_lea.sflag [#allocation8], %s1001_s21 }
  0x4b   : > { %s188_s22 = scalar_lea.vmem [#allocation7], %s599_s20 }
  0x4c   : > { %824 = dma.done.wait (%p1176_p4), %s185_s23, 128  }
  0x4d   : > { %826 = vsyncadd (%p1176_p4), %s185_s23, 4294967168 }
  0x4e   : > { %193 = sfence }
  0x4f   : > { %v1011_v0 = vld [vmem:[%s188_s22] sm:$0xff]  ;;  %vm217_vm0 = vcmask 1043456   ;;  %s602_s18 = sld [smem:[#allocation2 + $0x3]]  ;;  %s850_s25 = smov 16   ;;  %v252_v56 = vlaneseq  ;;  %v1053_v62 = vld [vmem:[#allocation6] sm:$0xff] }
  0x50   : > { %v234_v1 = vsel %vm217_vm0, %v1011_v0, -inf  ;;  %v218_v2 = vsel %vm217_vm0, %v1011_v0, 0.0  ;;  %v215_v3 = vcombine.high %v1011_v0, %v1011_v0  ;;  %s603_s26 = sld [smem:[#allocation2 + $0xc]]  ;;  %s851_s30 = smov 112  }
  0x51   : > { %v235_v4 = vrot.slane %v234_v1, 4  ;;  %v219_v5 = vrot.slane %v218_v2, 4  ;;  %s614_s27 = sld [smem:[#allocation2 + $0x5]]  ;;  %v1035_v57 = vshrl.u32 %v252_v56, 7  ;;  %v1041_v58 = vand.u32 127, %v252_v56  ;;  %p1177_p3 = scmp.ne.s32.totalorder %s1169_s9, 0 }
  0x52   : > { %v241_v6 = vsel %vm217_vm0, %v215_v3, -inf  ;;  %v225_v7 = vsel %vm217_vm0, %v215_v3, 0.0  ;;  %s615_s28 = sld [smem:[#allocation2 + $0xe]] }
  0x53   : > { %v236_v8 = vmax.f32 %v234_v1, %v235_v4  ;;  %v220_v9 = vadd.f32 %v219_v5, %v218_v2  ;;  %v242_v10 = vrot.slane %v241_v6, 4  ;;  %v226_v11 = vrot.slane %v225_v7, 4  ;;  %s608_s29 = sld [smem:[#allocation2 + $0x4]] }
  0x54   : > { %s609_s4 = sld [smem:[#allocation2 + $0xd]]  ;;  %v1048_v60 = vsub.s32 0, %v1035_v57  ;;  %v264_v61 = vsub.s32 4, %v1035_v57  ;;  %vm254_vm1 = vcmp.lt.s32.totalorder %v1041_v58, 16  ;;  %v279_v1 = vsub.s32 1, %v1035_v57 }
  0x55   : > { %v237_v12 = vrot.slane %v236_v8, 2  ;;  %v221_v13 = vrot.slane %v220_v9, 2  ;;  %v243_v14 = vmax.f32 %v241_v6, %v242_v10  ;;  %v227_v15 = vadd.f32 %v226_v11, %v225_v7  ;;  %s1029_s5 = sld [smem:[#allocation2 + $0x9]] }
  0x56   : > { %v316_v32 = vstv %s602_s18  ;;  %v320_v35 = vstv %s603_s26  ;;  %s1031_s6 = sld [smem:[#allocation2 + $0xa]]  ;;  %v283_v2 = vsub.s32 5, %v1035_v57  ;;  %v261_v3 = vrot.slane %v1053_v62, %v1048_v60 }
  0x57   : > { %v238_v16 = vmax.f32 %v236_v8, %v237_v12  ;;  %v222_v17 = vadd.f32 %v221_v13, %v220_v9  ;;  %v244_v18 = vrot.slane %v243_v14, 2  ;;  %v228_v19 = vrot.slane %v227_v15, 2  ;;  %s1033_s10 = sld [smem:[#allocation2 + $0xb]] }
  0x58   : > { %v403_v38 = vstv %s614_s27  ;;  %v407_v40 = vstv %s615_s28  ;;  %s1037_s8 = sld [smem:[#allocation2 + $0x6]]  ;;  %v265_v4 = vrot.slane %v1053_v62, %v264_v61  ;;  %vm274_vm2 = vcmp.lt.s32.totalorder %v1041_v58, 112  ;;  %s852_s28 = smov 1  }
  0x59   : > { %v239_v20 = vrot.slane %v238_v16, 1  ;;  %v223_v21 = vrot.slane %v222_v17, 1  ;;  %v245_v22 = vmax.f32 %v243_v14, %v244_v18  ;;  %v229_v23 = vadd.f32 %v228_v19, %v227_v15  ;;  %s1039_s11 = sld [smem:[#allocation2 + $0x7]] }
  0x5a   : > { %v369_v46 = vstv %s608_s29  ;;  %v373_v47 = vstv %s609_s4  ;;  %s1043_s17 = sld [smem:[#allocation2 + $0x8]]  ;;  %v280_v9 = vrot.slane %v1053_v62, %v279_v1  ;;  %v284_v10 = vrot.slane %v1053_v62, %v283_v2  ;;  %s853_s29 = smov 127  }
  0x5b   : > { %v240_v24 = vmax.f32 %v238_v16, %v239_v20  ;;  %v224_v25 = vadd.f32 %v223_v21, %v222_v17  ;;  %v246_v26 = vrot.slane %v245_v22, 1  ;;  %v230_v27 = vrot.slane %v229_v23, 1  ;;  %s1045_s23 = sld [smem:[#allocation2]]  ;;  %s627_s4 = sshll.u32 %s896_s16, 7 }
  0x5c   : > { %s1051_s22 = sld [smem:[#allocation2 + $0x1]]  ;;  %v310_v11 = vstv %s1029_s5  ;;  %v363_v12 = vstv %s1031_s6  ;;  %vm343_vm3 = vcmp.lt.s32.totalorder %v1041_v58, 1  ;;  %vm430_vm4 = vcmp.lt.s32.totalorder %v1041_v58, 127  ;;  %s211_s5 = scalar_lea.vmem [#allocation9], %s599_s20 }
  0x5d   : > { %289 = vrot.lane.b32.xlu1 %v240_v24, %s850_s25  ;;  %v232_v28 = vmul.f32 0.25, %v224_v25  ;;  %v247_v29 = vmax.f32 %v245_v22, %v246_v26  ;;  %v231_v30 = vadd.f32 %v230_v27, %v229_v23  ;;  %v321_v36 = vmul.f32 %v320_v35, %v240_v24  ;;  %s1055_s18 = sld [smem:[#allocation2 + $0x2]]  ;;  %s494_s6 = sshll.u32 %s211_s5, 4  ;;  %s495_s6 = int_to_ptr.vmem [resolvable:$true] %s494_s6 }
  0x5e   : > { %v408_v44 = vmul.f32 %v407_v40, %v240_v24  ;;  %v374_v52 = vmul.f32 %v373_v47, %v240_v24  ;;  %s1062_s26 = sld [smem:[#allocation2 + $0x10]]  ;;  %v397_v13 = vstv %s1033_s10  ;;  %v328_v16 = vstv %s1037_s8 }
  0x5f   : > { %248 = vrot.lane.b32.xlu0 %v232_v28, %s850_s25  ;;  %v233_v31 = vmul.f32 0.25, %v231_v30  ;;  %v317_v33 = vmul.f32 %v316_v32, %v232_v28  ;;  %v322_v37 = vmul.f32 %v320_v35, %v247_v29  ;;  %v404_v39 = vmul.f32 %v403_v38, %v232_v28  ;;  %s1067_s27 = sld [smem:[#allocation2 + $0x11]] }
  0x60   : > { %v409_v45 = vmul.f32 %v407_v40, %v247_v29  ;;  %v370_v50 = vmul.f32 %v369_v46, %v232_v28  ;;  %v375_v53 = vmul.f32 %v373_v47, %v247_v29  ;;  %v381_v17 = vstv %s1039_s11  ;;  %s492_s11 = scalar_lea.hbm %s1159_s3, %s627_s4 }
  0x61   : > { %291 = vrot.lane.b32.xlu1 %v247_v29, %s850_s25  ;;  %v318_v34 = vmul.f32 %v316_v32, %v233_v31  ;;  %v405_v41 = vmul.f32 %v403_v38, %v233_v31  ;;  %v1017_v42 = vadd.f32 %v321_v36, %v317_v33  ;;  %v1021_v48 = vadd.f32 %v408_v44, %v404_v39 }
  0x62   : > { %v371_v51 = vmul.f32 %v369_v46, %v233_v31  ;;  %v1025_v54 = vadd.f32 %v374_v52, %v370_v50  ;;  %v415_v19 = vstv %s1043_s17  ;;  %v306_v22 = vstv %s1045_s23  ;;  %s480_s17 = scalar_lea.sflag [#allocation4], %s1001_s21  ;;  %s773_s23 = scalar_lea.vmem %s495_s6, 128 }
  0x63   : > { %270 = vrot.lane.b32.xlu0 %v232_v28, %s851_s30  ;;  %v1019_v43 = vadd.f32 %v322_v37, %v318_v34  ;;  %v1023_v49 = vadd.f32 %v409_v45, %v405_v41  ;;  %v359_v25 = vstv %s1051_s22  ;;  %v393_v26 = vstv %s1055_s18  ;;  %p774_p8 = scmp.ne.s32.totalorder %s495_s6, %s773_s23  ;;  %s854_s22 = smov [#allocation9]  }
  0x64   : > { %v1027_v55 = vadd.f32 %v375_v53, %v371_v51  ;;  %s777_s16 = sshll.u32 %s854_s22, 4  ;;  %s778_s16 = int_to_ptr.vmem [resolvable:$false] %s777_s16 }
  0x65   : > { %272 = vrot.lane.b32.xlu1 %v233_v31, %s851_s30  ;;  %v419_v35 = vstv %s1067_s27  ;;  %p775_p11 = pnand %p774_p8, %p1177_p3  ;;  %s779_s20 = scalar_lea.vmem %s778_s16, 256 }
  0x66   : > { %p780_p13 = scmp.lt.s32.totalorder %s495_s6, %s778_s16  ;;  %p781_p0 = scmp.lt.s32.totalorder %s779_s20, %s773_s23 }
  0x67   : > { %250 = vrot.lane.b32.xlu0 %v233_v31, %s850_s25  ;;  %s1060_s25 = sld [smem:[#allocation2 + $0xf]]  ;;  %v385_v31 = vstv %s1062_s26  ;;  %p776_p1 = pneg %p775_p11 }
  0x68   : > { %p782_p2 = por %p781_p0, %p780_p13 }
  0x69   : > { %299 = vrot.lane.b32.xlu1 %v247_v29, %s851_s30 }
  0x6a   : > { %p783_p5 = pnand %p782_p2, %p776_p1 }
  0x6b   : > { %297 = vrot.lane.b32.xlu0 %v240_v24, %s851_s30  ;;  %s618_s30 = sld [smem:[#allocation2 + $0x12]] }
  0x6d   : > { %v332_v30 = vstv %s1060_s25 }
  0xcf   : > { %v290_v59 = vpop.permute.xlu1 %289 }
  0xd1   : > { %v249_v63 = vpop.permute.xlu0 %248 }
  0xd3   : > { %v292_v5 = vpop.permute.xlu1 %291 }
  0xd4   : > { %v293_v6 = vsel %vm254_vm1, %v290_v59, %v292_v5  ;;  %v294_v7 = vsel %vm254_vm1, %v292_v5, %v290_v59 }
  0xd5   : > { %v271_v8 = vpop.permute.xlu0 %270  ;;  %v295_v14 = vmul.f32 %v294_v7, %v261_v3  ;;  %v296_v15 = vmul.f32 %v293_v6, %v265_v4 }
  0xd7   : > { %v273_v18 = vpop.permute.xlu1 %272  ;;  %v311_v32 = vmul.f32 %v310_v11, %v295_v14  ;;  %v312_v33 = vmul.f32 %v310_v11, %v296_v15  ;;  %v364_v34 = vmul.f32 %v363_v12, %v295_v14  ;;  %v365_v36 = vmul.f32 %v363_v12, %v296_v15 }
  0xd8   : > { %v275_v20 = vsel %vm274_vm2, %v271_v8, %v273_v18  ;;  %v276_v21 = vsel %vm274_vm2, %v273_v18, %v271_v8  ;;  %v398_v37 = vmul.f32 %v397_v13, %v295_v14  ;;  %v399_v41 = vmul.f32 %v397_v13, %v296_v15 }
  0xd9   : > { %v287_v23 = vmul.f32 %v280_v9, %v275_v20  ;;  %v288_v24 = vmul.f32 %v284_v10, %v276_v21  ;;  %v251_v27 = vpop.permute.xlu0 %250 }
  0xda   : > { %v255_v28 = vsel %vm254_vm1, %v249_v63, %v251_v27  ;;  %v256_v29 = vsel %vm254_vm1, %v251_v27, %v249_v63 }
  0xdb   : > { %v268_v38 = vmul.f32 %v261_v3, %v256_v29  ;;  %v269_v39 = vmul.f32 %v265_v4, %v255_v28  ;;  %v300_v40 = vpop.permute.xlu1 %299  ;;  %v329_v44 = vmul.f32 %v328_v16, %v287_v23  ;;  %v330_v45 = vmul.f32 %v328_v16, %v288_v24 }
  0xdc   : > { %v382_v46 = vmul.f32 %v381_v17, %v287_v23  ;;  %v416_v5 = vmul.f32 %v415_v19, %v287_v23  ;;  %v417_v6 = vmul.f32 %v415_v19, %v288_v24 }
  0xdd   : > { %v298_v47 = vpop.permute.xlu0 %297  ;;  %v307_v50 = vmul.f32 %v306_v22, %v268_v38  ;;  %v308_v51 = vmul.f32 %v306_v22, %v269_v39  ;;  %v360_v52 = vmul.f32 %v359_v25, %v268_v38  ;;  %v361_v53 = vmul.f32 %v359_v25, %v269_v39 }
  0xde   : > { %v394_v56 = vmul.f32 %v393_v26, %v268_v38  ;;  %v395_v59 = vmul.f32 %v393_v26, %v269_v39  ;;  %v301_v61 = vsel %vm274_vm2, %v298_v47, %v300_v40  ;;  %v302_v63 = vsel %vm274_vm2, %v300_v40, %v298_v47 }
  0xdf   : > { %v366_v1 = vadd.f32 %v364_v34, %v360_v52  ;;  %v367_v2 = vadd.f32 %v365_v36, %v361_v53  ;;  %v303_v3 = vmul.f32 %v301_v61, %v280_v9  ;;  %v304_v4 = vmul.f32 %v302_v63, %v284_v10 }
  0xe0   : > { %v313_v7 = vadd.f32 %v311_v32, %v307_v50  ;;  %v314_v8 = vadd.f32 %v312_v33, %v308_v51  ;;  %v400_v14 = vadd.f32 %v398_v37, %v394_v56  ;;  %v401_v20 = vadd.f32 %v399_v41, %v395_v59 }
  0xe1   : > { %v333_v11 = vmul.f32 %v332_v30, %v303_v3  ;;  %v334_v12 = vmul.f32 %v332_v30, %v304_v4  ;;  %v386_v13 = vmul.f32 %v385_v31, %v303_v3  ;;  %v387_v15 = vmul.f32 %v385_v31, %v304_v4 }
  0xe2   : > { %v420_v16 = vmul.f32 %v419_v35, %v303_v3  ;;  %v421_v18 = vmul.f32 %v419_v35, %v304_v4  ;;  %v325_v21 = vadd.f32 %v1017_v42, %v313_v7  ;;  %v326_v25 = vadd.f32 %v1019_v43, %v314_v8 }
  0xe3   : > { %v335_v22 = vadd.f32 %v333_v11, %v329_v44  ;;  %v336_v26 = vadd.f32 %v334_v12, %v330_v45  ;;  %v383_v9 = vmul.f32 %v381_v17, %v288_v24  ;;  %v378_v19 = vadd.f32 %v1025_v54, %v366_v1 }
  0xe4   : > { %v422_v10 = vadd.f32 %v420_v16, %v416_v5  ;;  %v423_v23 = vadd.f32 %v421_v18, %v417_v6  ;;  %v379_v29 = vadd.f32 %v1027_v55, %v367_v2  ;;  %v388_v30 = vadd.f32 %v386_v13, %v382_v46 }
  0xe5   : > { %v337_v27 = vadd.f32 %v335_v22, %v325_v21  ;;  %v338_v28 = vadd.f32 %v336_v26, %v326_v25  ;;  %v389_v31 = vadd.f32 %v387_v15, %v383_v9  ;;  %v412_v42 = vadd.f32 %v1021_v48, %v400_v14 }
  0xe6   : > { %v413_v32 = vadd.f32 %v1023_v49, %v401_v20  ;;  %v390_v43 = vadd.f32 %v388_v30, %v378_v19  ;;  %v348_v54 = vsub.s32 2, %v1035_v57  ;;  %v352_v55 = vsub.s32 6, %v1035_v57 }
  0xe7   : > { %339 = vrot.lane.b32.xlu0 %v337_v27, %s852_s28  ;;  %341 = vrot.lane.b32.xlu1 %v338_v28, %s852_s28  ;;  %v391_v33 = vadd.f32 %v389_v31, %v379_v29  ;;  %v424_v17 = vadd.f32 %v422_v10, %v412_v42  ;;  %v435_v34 = vsub.s32 3, %v1035_v57  ;;  %v439_v48 = vsub.s32 7, %v1035_v57 }
  0xe8   : > { %v425_v24 = vadd.f32 %v423_v23, %v413_v32  ;;  %v349_v49 = vrot.slane %v1053_v62, %v348_v54  ;;  %v353_v36 = vrot.slane %v1053_v62, %v352_v55  ;;  %v448_v50 = vstv %s618_s30 }
  0xe9   : > { %v436_v40 = vrot.slane %v1053_v62, %v435_v34  ;;  %v440_v41 = vrot.slane %v1053_v62, %v439_v48 }
  0xeb   : > { %426 = vrot.lane.b32.xlu0 %v424_v17, %s853_s29  ;;  %428 = vrot.lane.b32.xlu1 %v425_v24, %s853_s29 }
 0x159   : > { %v340_v35 = vpop.permute.xlu0 %339  ;;  %v342_v37 = vpop.permute.xlu1 %341 }
 0x15a   : > { %v344_v38 = vsel %vm343_vm3, %v340_v35, %v342_v37  ;;  %v345_v39 = vsel %vm343_vm3, %v342_v37, %v340_v35 }
 0x15b   : > { %v356_v44 = vmul.f32 %v349_v49, %v345_v39  ;;  %v357_v45 = vmul.f32 %v353_v36, %v344_v38 }
 0x15d   : > { %v427_v46 = vpop.permute.xlu0 %426  ;;  %v429_v47 = vpop.permute.xlu1 %428  ;;  %v445_v56 = vadd.f32 %v390_v43, %v356_v44  ;;  %v446_v59 = vadd.f32 %v391_v33, %v357_v45 }
 0x15e   : > { %v431_v57 = vsel %vm430_vm4, %v427_v46, %v429_v47  ;;  %v432_v51 = vsel %vm430_vm4, %v429_v47, %v427_v46 }
 0x15f   : > { %v443_v52 = vmul.f32 %v436_v40, %v431_v57  ;;  %v444_v53 = vmul.f32 %v440_v41, %v432_v51 }
 0x161   : > { %v449_v61 = vadd.f32 %v448_v50, %v443_v52  ;;  %v450_v63 = vadd.f32 %v448_v50, %v444_v53 }
 0x163   : > { %v451_v1 = vadd.f32 %v449_v61, %v445_v56  ;;  %v452_v58 = vadd.f32 %v450_v63, %v446_v59 }
 0x165   : > { %v619_v2 = vmul.f32 -1.442695, %v451_v1  ;;  %v620_v3 = vmul.f32 -1.442695, %v452_v58 }
 0x167   : > { %700 = vpow2.f32 %v619_v2 }
 0x168   : > { %702 = vpow2.f32 %v620_v3 }
 0x174   : > { %v701_v62 = vpop.eup %700 }
 0x175   : > { %v703_v4 = vpop.eup %702  ;;  %v459_v5 = vadd.f32 1.0, %v701_v62 }
 0x176   : > { %v460_v6 = vadd.f32 1.0, %v703_v4 }
 0x177   : > { %704 = vrcp.f32 %v459_v5 }
 0x178   : > { %706 = vrcp.f32 %v460_v6 }
 0x184   : > { %v705_v7 = vpop.eup %704 }
 0x185   : > { %v707_v8 = vpop.eup %706  ;;  %v468_v11 = vrot.slane %v705_v7, %v1048_v60 }
 0x186   : > { %v472_v12 = vrot.slane %v707_v8, %v1048_v60 }
 0x188   : > { %v475_v13 = vcombine.low %v468_v11, %v472_v12 }
 0x18a   : > { %v477_v14 = vmul.f32 %v475_v13, %v1011_v0 }
 0x18c   : > { %478 = vst [vmem:[%s211_s5] sm:$0xff] %v477_v14 }
 0x18d   : > { %786 = shalt.err (!%p783_p5)
}
 0x18e   : > { %s787_s18 = scalar_lea.hbm %s492_s11, 128  ;;  %s791_s26 = scalar_lea.hbm %s1159_s3, 256 }
 0x18f   : > { %p788_p7 = scmp.ne.s32.totalorder %s492_s11, %s787_s18  ;;  %p792_p12 = scmp.lt.s32.totalorder %s492_s11, %s1159_s3 }
 0x190   : > { %p793_p9 = scmp.lt.s32.totalorder %s791_s26, %s787_s18 }
 0x191   : > { %p789_p10 = pnand %p788_p7, %p1177_p3 }
 0x192   : > { %p794_p4 = por %p793_p9, %p792_p12 }
 0x193   : > { %p790_p6 = pneg %p789_p10 }
 0x195   : > { %p795_p8 = pnand %p794_p4, %p790_p6 }
 0x197   : > { %798 = shalt.err (!%p795_p8)
}
 0x198   : > { %638 = dma.vmem_to_hbm [thread:$0]  (%p1177_p3), %s495_s6, 128, %s492_s11, %s480_s17  }
 0x199 PF: > { %s506_s29 = sand.u32 1, %s833_s12   ;;  %p1178_p11 = scmp.ne.s32.totalorder %s1165_s19, 0 }
 0x19a   : > { %p1179_p1 = scmp.ge.s32.totalorder %s845_s15, 2  ;;  %s507_s30 = scalar_lea.sflag [#allocation4], %s506_s29 }
 0x19c   : > { %p652_p13 = pnand %p1179_p1, %p1178_p11 }
 0x19e   : > { %p653_p0 = pneg %p652_p13 }
 0x1a0   : > { %828 = dma.done.wait (%p653_p0), %s507_s30, 128  }
 0x1a1   : > { %830 = vsyncadd (%p653_p0), %s507_s30, 4294967168  ;;  %p18_p2 = scmp.ge.s32.totalorder %s929_s24, 4   ;;  %s1180_s12 = smov %s837_s13 }
 0x1a2   : > { %s1181_s13 = smov %s841_s14  ;;  %s1182_s14 = smov %s953_s7 }
 0x1a3   : > { %s1183_s15 = smov %s929_s24  ;;  %20 = sbr.rel (!%p18_p2) target bundleno = 7 (0x7), region = 87 }
 0x1a8   :  { %512 = vsyncpa [#allocation3], 1 }
 0x1a9   :  { %514 = vsyncpa [#allocation3 + $0x1], 1 }
 0x1aa   :  { %515 = vsyncpa [#allocation8], 1 }
 0x1ab   :  { %517 = vsyncpa [#allocation8 + $0x1], 1 }
 0x1ac   :  { %518 = vsyncpa [#allocation4], 1 }
 0x1ad   :  { %520 = vsyncpa [#allocation4 + $0x1], 1 }
 0x1ae   :  { %521 = vsyncpa [#allocation5], 1 }
 0x1af   :  { %523 = vsyncpa [#allocation5 + $0x1], 1 }

</bundles_post_ra>
